<compile_context>
chip_gen: v5e
topology: v5e:2x2
jax: 0.10.0
libtpu: 0.0.40
codegen_flags: <defaults>
</compile_context>

<pallas_src>
import functools

import jax
import jax.numpy as jnp
from jax.experimental import pallas as pl
from jax.experimental.pallas import tpu as pltpu

_LANE = 128  # TPU lane width; batch tile must be a multiple of this.


def _mlp_kernel(n_layers, *refs):
    """Fused MLP forward: (Linear -> ReLU) * (n_layers-1) -> Linear.

    refs = (x_ref, w0, b0, w1, b1, ..., w_{n-1}, b_{n-1}, o_ref)
    x_ref: [F, tb]   (features x batch-lanes)
    w_i:   [out_i, in_i]   (PyTorch-native layout)
    b_i:   [out_i, 1]      (broadcasts over the lane/batch axis)
    o_ref: [out_dim, tb]
    """
    x_ref = refs[0]
    o_ref = refs[-1]
    h = x_ref[...]  # already f32; no per-layer casts (perf feedback)
    for i in range(n_layers):
        w = refs[1 + 2 * i][...]
        b = refs[2 + 2 * i][...]
        h = jnp.dot(w, h, preferred_element_type=jnp.float32) + b
        if i + 1 < n_layers:
            h = jnp.maximum(h, 0.0)  # nn.ReLU after every hidden Linear
    o_ref[...] = h.astype(o_ref.dtype)


def mlp_forward(x, params, *, batch_tile=512):
    """Run the fused MLP Pallas kernel.

    x:      [B, F] float32 (PyTorch-style batch-major input).
    params: list of (W [out, in], b [out, 1]) for each Linear layer.
    batch_tile: lanes per grid step (rounded to a multiple of 128).
    """
    B, F = x.shape
    n_layers = len(params)
    out_dim = params[-1][0].shape[0]

    # Lane tile: multiple of 128, no larger than needed to cover B.
    tb = max(_LANE, min(batch_tile, pl.cdiv(B, _LANE) * _LANE))
    tb = (tb // _LANE) * _LANE
    b_pad = pl.cdiv(B, tb) * tb

    # Batch on the lane axis; pad lanes to a tile multiple (sliced off below).
    x_t = x.T  # [F, B]
    if b_pad != B:
        x_t = jnp.pad(x_t, ((0, 0), (0, b_pad - B)))

    flat_params = []
    in_specs = [pl.BlockSpec((F, tb), lambda i: (0, i))]
    for (w, b) in params:
        flat_params.extend([w, b])
        # Weights/biases are small: full tensor resident in VMEM every step.
        # TODO(synk): if hidden sizes grow to multi-MiB weights, tile the
        # K/N dims (or store bf16) to respect v7x's 64 MiB VMEM.
        in_specs.append(pl.BlockSpec(w.shape, lambda i: (0, 0)))
        in_specs.append(pl.BlockSpec(b.shape, lambda i: (0, 0)))

    out_spec = pl.BlockSpec((out_dim, tb), lambda i: (0, i))

    kernel = functools.partial(_mlp_kernel, n_layers)

    # Advisory cost estimate: this kernel is HBM-bound at scale.
    flops = 2 * B * sum(int(w.shape[0]) * int(w.shape[1]) for w, _ in params)
    bytes_accessed = 4 * (
        B * F + B * out_dim
        + sum(int(w.size) + int(b.size) for w, b in params)
    )
    cost = pl.CostEstimate(
        flops=flops, transcendentals=0, bytes_accessed=bytes_accessed
    )

    out_t = pl.pallas_call(
        kernel,
        out_shape=jax.ShapeDtypeStruct((out_dim, b_pad), x.dtype),
        grid_spec=pl.GridSpec(
            grid=(b_pad // tb,),
            in_specs=in_specs,
            out_specs=out_spec,
        ),
        compiler_params=pltpu.CompilerParams(
            dimension_semantics=("parallel",),  # megacore-shardable batch axis
        ),
        cost_estimate=cost,
    )(x_t, *flat_params)

    # Back to [B, out_dim]; drop lane padding.
    return out_t.T[:B]


def init_mlp_params(key, input_layer_size, output_layer_size, hidden_layer_sizes):
    """Deterministic init mirroring nn.Linear's U(-1/sqrt(fan_in), +1/sqrt(fan_in)).

    Weights kept in PyTorch-native [out_features, in_features]; biases [out, 1].
    """
    sizes = [input_layer_size] + list(hidden_layer_sizes) + [output_layer_size]
    params = []
    for fan_in, fan_out in zip(sizes[:-1], sizes[1:]):
        key, kw, kb = jax.random.split(key, 3)
        bound = 1.0 / (fan_in ** 0.5)
        w = jax.random.uniform(kw, (fan_out, fan_in), jnp.float32, -bound, bound)
        b = jax.random.uniform(kb, (fan_out, 1), jnp.float32, -bound, bound)
        params.append((w, b))
    return params


def mlp_reference(x, params):
    """Pure-JAX reference of the same forward pass ([out, in] weights)."""
    h = x
    n = len(params)
    for i, (w, b) in enumerate(params):
        h = h @ w.T + b[:, 0]
        if i + 1 < n:
            h = jnp.maximum(h, 0.0)
    return h


if __name__ == "__main__":
    # Module config: input=16, hidden=[32, 16], output=8, dropout=None.
    # TODO(synk): nn.Dropout only acts in training mode; inference (eval)
    # semantics are identity, so dropout is omitted here.
    input_size, output_size, hidden_sizes = 16, 8, [32, 16]
    batch = 1024  # 2 grid steps of 512 lanes each (megacore-friendly on v7x)

    key = jax.random.PRNGKey(0)
    key, kx = jax.random.split(key)
    x = jax.random.normal(kx, (batch, input_size), jnp.float32)
    params = init_mlp_params(key, input_size, output_size, hidden_sizes)

    out = mlp_forward(x, params)
    out = jax.block_until_ready(out)

    ref = mlp_reference(x, params)
    assert out.shape == (batch, output_size)
    assert jnp.allclose(out, ref, atol=1e-5, rtol=1e-5), "mismatch vs reference"

    print("KERNEL_OK")
</pallas_src>

<mosaic_0001>
module attributes {stable_mosaic.version = 11 : i64} {
  func.func @_mlp_kernel(%arg0: i32, %arg1: memref<16x512xf32, #tpu.memory_space<vmem>>, %arg2: memref<32x16xf32, #tpu.memory_space<vmem>>, %arg3: memref<32x1xf32, #tpu.memory_space<vmem>>, %arg4: memref<16x32xf32, #tpu.memory_space<vmem>>, %arg5: memref<16x1xf32, #tpu.memory_space<vmem>>, %arg6: memref<8x16xf32, #tpu.memory_space<vmem>>, %arg7: memref<8x1xf32, #tpu.memory_space<vmem>>, %arg8: memref<8x512xf32, #tpu.memory_space<vmem>>) attributes {dimension_semantics = [#tpu.dimension_semantics<parallel>], iteration_bounds = array<i64: 2>, scalar_prefetch = 0 : i64, scratch_operands = 0 : i64, tpu.core_type = #tpu.core_type<tc>, window_params = [{transform_indices = @transform_0, window_bounds = array<i64: 16, 512>}, {pipeline_mode = #tpu.pipeline_mode<synchronous>, transform_indices = @transform_1, window_bounds = array<i64: 32, 16>}, {pipeline_mode = #tpu.pipeline_mode<synchronous>, transform_indices = @transform_2, window_bounds = array<i64: 32, 1>}, {pipeline_mode = #tpu.pipeline_mode<synchronous>, transform_indices = @transform_3, window_bounds = array<i64: 16, 32>}, {pipeline_mode = #tpu.pipeline_mode<synchronous>, transform_indices = @transform_4, window_bounds = array<i64: 16, 1>}, {pipeline_mode = #tpu.pipeline_mode<synchronous>, transform_indices = @transform_5, window_bounds = array<i64: 8, 16>}, {pipeline_mode = #tpu.pipeline_mode<synchronous>, transform_indices = @transform_6, window_bounds = array<i64: 8, 1>}, {transform_indices = @transform_7, window_bounds = array<i64: 8, 512>}]} {
    %c0 = arith.constant 0 : index
    %c0_0 = arith.constant 0 : index
    %0 = vector.load %arg1[%c0, %c0_0] : memref<16x512xf32, #tpu.memory_space<vmem>>, vector<16x512xf32>
    %c0_1 = arith.constant 0 : index
    %c0_2 = arith.constant 0 : index
    %1 = vector.load %arg2[%c0_1, %c0_2] : memref<32x16xf32, #tpu.memory_space<vmem>>, vector<32x16xf32>
    %c0_3 = arith.constant 0 : index
    %c0_4 = arith.constant 0 : index
    %2 = vector.load %arg3[%c0_3, %c0_4] : memref<32x1xf32, #tpu.memory_space<vmem>>, vector<32x1xf32>
    %cst = arith.constant dense<0.000000e+00> : vector<32x512xf32>
    %3 = tpu.matmul %1, %0, %cst {dimension_numbers = #tpu.dot_dimension_numbers<[1], [0], [0], [1], [0, 0, 1, 1], [], []>} : vector<32x16xf32>, vector<16x512xf32>, vector<32x512xf32> -> vector<32x512xf32>
    %4 = vector.broadcast %2 : vector<32x1xf32> to vector<32x512xf32>
    %5 = arith.addf %3, %4 : vector<32x512xf32>
    %cst_5 = arith.constant 0.000000e+00 : f32
    %6 = vector.broadcast %cst_5 : f32 to vector<32x512xf32>
    %7 = arith.maximumf %5, %6 : vector<32x512xf32>
    %c0_6 = arith.constant 0 : index
    %c0_7 = arith.constant 0 : index
    %8 = vector.load %arg4[%c0_6, %c0_7] : memref<16x32xf32, #tpu.memory_space<vmem>>, vector<16x32xf32>
    %c0_8 = arith.constant 0 : index
    %c0_9 = arith.constant 0 : index
    %9 = vector.load %arg5[%c0_8, %c0_9] : memref<16x1xf32, #tpu.memory_space<vmem>>, vector<16x1xf32>
    %cst_10 = arith.constant dense<0.000000e+00> : vector<16x512xf32>
    %10 = tpu.matmul %8, %7, %cst_10 {dimension_numbers = #tpu.dot_dimension_numbers<[1], [0], [0], [1], [0, 0, 1, 1], [], []>} : vector<16x32xf32>, vector<32x512xf32>, vector<16x512xf32> -> vector<16x512xf32>
    %11 = vector.broadcast %9 : vector<16x1xf32> to vector<16x512xf32>
    %12 = arith.addf %10, %11 : vector<16x512xf32>
    %cst_11 = arith.constant 0.000000e+00 : f32
    %13 = vector.broadcast %cst_11 : f32 to vector<16x512xf32>
    %14 = arith.maximumf %12, %13 : vector<16x512xf32>
    %c0_12 = arith.constant 0 : index
    %c0_13 = arith.constant 0 : index
    %15 = vector.load %arg6[%c0_12, %c0_13] : memref<8x16xf32, #tpu.memory_space<vmem>>, vector<8x16xf32>
    %c0_14 = arith.constant 0 : index
    %c0_15 = arith.constant 0 : index
    %16 = vector.load %arg7[%c0_14, %c0_15] : memref<8x1xf32, #tpu.memory_space<vmem>>, vector<8x1xf32>
    %cst_16 = arith.constant dense<0.000000e+00> : vector<8x512xf32>
    %17 = tpu.matmul %15, %14, %cst_16 {dimension_numbers = #tpu.dot_dimension_numbers<[1], [0], [0], [1], [0, 0, 1, 1], [], []>} : vector<8x16xf32>, vector<16x512xf32>, vector<8x512xf32> -> vector<8x512xf32>
    %18 = vector.broadcast %16 : vector<8x1xf32> to vector<8x512xf32>
    %19 = arith.addf %17, %18 : vector<8x512xf32>
    %c0_17 = arith.constant 0 : index
    %c0_18 = arith.constant 0 : index
    %20 = vector.load %arg8[%c0_17, %c0_18] : memref<8x512xf32, #tpu.memory_space<vmem>>, vector<8x512xf32>
    tpu.vector_store %arg8[%c0_17, %c0_18], %19 {strides = array<i32>} : memref<8x512xf32, #tpu.memory_space<vmem>>, vector<8x512xf32>,
    return
  }
  func.func @transform_0(%arg0: i32) -> (i32, i32) {
    %c0_i32 = arith.constant 0 : i32
    %c0_i32_0 = arith.constant 0 : i32
    return %c0_i32, %arg0 : i32, i32
  }
  func.func @transform_1(%arg0: i32) -> (i32, i32) {
    %c0_i32 = arith.constant 0 : i32
    %c0_i32_0 = arith.constant 0 : i32
    %c0_i32_1 = arith.constant 0 : i32
    return %c0_i32, %c0_i32_0 : i32, i32
  }
  func.func @transform_2(%arg0: i32) -> (i32, i32) {
    %c0_i32 = arith.constant 0 : i32
    %c0_i32_0 = arith.constant 0 : i32
    %c0_i32_1 = arith.constant 0 : i32
    return %c0_i32, %c0_i32_0 : i32, i32
  }
  func.func @transform_3(%arg0: i32) -> (i32, i32) {
    %c0_i32 = arith.constant 0 : i32
    %c0_i32_0 = arith.constant 0 : i32
    %c0_i32_1 = arith.constant 0 : i32
    return %c0_i32, %c0_i32_0 : i32, i32
  }
  func.func @transform_4(%arg0: i32) -> (i32, i32) {
    %c0_i32 = arith.constant 0 : i32
    %c0_i32_0 = arith.constant 0 : i32
    %c0_i32_1 = arith.constant 0 : i32
    return %c0_i32, %c0_i32_0 : i32, i32
  }
  func.func @transform_5(%arg0: i32) -> (i32, i32) {
    %c0_i32 = arith.constant 0 : i32
    %c0_i32_0 = arith.constant 0 : i32
    %c0_i32_1 = arith.constant 0 : i32
    return %c0_i32, %c0_i32_0 : i32, i32
  }
  func.func @transform_6(%arg0: i32) -> (i32, i32) {
    %c0_i32 = arith.constant 0 : i32
    %c0_i32_0 = arith.constant 0 : i32
    %c0_i32_1 = arith.constant 0 : i32
    return %c0_i32, %c0_i32_0 : i32, i32
  }
  func.func @transform_7(%arg0: i32) -> (i32, i32) {
    %c0_i32 = arith.constant 0 : i32
    %c0_i32_0 = arith.constant 0 : i32
    return %c0_i32, %arg0 : i32, i32
  }
}

</mosaic_0001>

<bundles_post_ra>
// kernel: tpu_custom_call.1
= control target key start
LH: loop header
LB: loop body
LE: loop exit
PB: predicated region body
PF: predicated region fallthrough
CT: control target
= control target key end

     0   :  { %12 = vsyncpa [#allocation3], 0  ;;  %s1219_s0 = inlined_call_operand.hbm [shape: f32[16,1024], index: 0, kind: input, shape index: {}]   ;;  %s1220_s1 = inlined_call_operand.vmem [shape: f32[32,16], index: 1, kind: input, shape index: {}]   ;;  %s1221_s2 = inlined_call_operand.vmem [shape: f32[32,1], index: 2, kind: input, shape index: {}]   ;;  %s1222_s3 = inlined_call_operand.vmem [shape: f32[16,32], index: 3, kind: input, shape index: {}]   ;;  %s1223_s4 = inlined_call_operand.vmem [shape: f32[16,1], index: 4, kind: input, shape index: {}]   ;;  %s1224_s5 = inlined_call_operand.vmem [shape: f32[8,16], index: 5, kind: input, shape index: {}]   ;;  %s1225_s6 = inlined_call_operand.vmem [shape: f32[8,1], index: 6, kind: input, shape index: {}]   ;;  %s1226_s7 = inlined_call_operand.hbm [shape: f32[8,1024], index: 7, kind: output, shape index: {}]  }
   0x1   :  { %14 = vsyncpa [#allocation3 + $0x1], 0 }
   0x2   :  { %15 = vsyncpa [#allocation4], 0 }
   0x3   :  { %17 = vsyncpa [#allocation4 + $0x1], 0  ;;  %s1023_s24 = smov 0   ;;  %s1025_s25 = smov 0  }
   0x4   :  { %s1027_s26 = smov 0   ;;  %s1029_s27 = smov 0  }
   0x5 LB: > { %s1044_s28 = sadd.s32 4294967295, %s977_s27   ;;  %s784_s29 = sadd.s32 4294967294, %s977_s27   ;;  %s977_s27 = sphi %s1029_s27, %s1237_s27   ;;  %s973_s26 = sphi %s1027_s26, %s1236_s26   ;;  %s969_s25 = sphi %s1025_s25, %s1235_s25   ;;  %s965_s24 = sphi %s1023_s24, %s1234_s24  }
   0x6   : > { %s1048_s30 = sadd.s32 1, %s977_s27   ;;  %s30_s8 = sadd.s32 1, %s973_s26 }
   0x7   : > { %s27_s9 = ssub.s32 %s977_s27, %s1048_s30  ;;  %p37_p0 = scmp.ne.s32.totalorder %s973_s26, %s969_s25 }
   0x8   : > { %p28_p1 = scmp.eq.s32.totalorder %s27_s9, 0  ;;  %p38_p2 = scmp.eq.s32.totalorder %s977_s27, 0 }
   0x9   : > { %p43_p3 = scmp.ne.s32.totalorder %s969_s25, %s965_s24  ;;  %p44_p4 = scmp.eq.s32.totalorder %s1044_s28, 0 }
   0xa   : > { %s1060_s10 = scalar_select %p28_p1, %s973_s26, %s30_s8  }
   0xb   : > { %p1062_p5 = por %p38_p2, %p37_p0  ;;  %p1066_p6 = por %p44_p4, %p43_p3 }
   0xc   : > { %1227 = sst [smem:[#allocation8_spill]] %s1060_s10  ;;  %p193_p7 = scmp.eq.s32.totalorder %s1044_s28, 1 }
   0xd   : > { %p199_p8 = scmp.eq.s32.totalorder %s784_s29, 1  ;;  %p786_p9 = scmp.ge.s32.totalorder %s977_s27, 2 }
   0xe   : > { %p840_p10 = scmp.lt.s32.totalorder %s977_s27, 2  ;;  %p1073_p11 = por %p193_p7, %p37_p0 }
   0xf   : > { %p1077_p12 = por %p199_p8, %p43_p3  ;;  %s237_s15 = sand.u32 1, %s973_s26  }
  0x10   : > { %s826_s16 = sshll.u32 %s977_s27, 5  ;;  %s787_s17 = sshll.u32 %s237_s15, 6 }
  0x11   : > { %s246_s20 = scalar_lea.hbm %s1219_s0, %s826_s16  ;;  %s241_s22 = scalar_lea.vmem [#allocation2], %s787_s17 }
  0x12   : > { %s247_s21 = sshll.u32 %s246_s20, 4  ;;  %s249_s23 = sshll.u32 %s241_s22, 4  ;;  %s248_s21 = int_to_ptr.hbm [resolvable:$true] %s247_s21  ;;  %s250_s23 = int_to_ptr.vmem [resolvable:$true] %s249_s23 }
  0x13   : > { %p1088_p13 = pnand %p840_p10, %p1062_p5  ;;  %p790_p0 = scmp.ge.s32.totalorder %s977_s27, 1 }
  0x14   : > { %s238_s8 = scalar_lea.sflag [#allocation3], %s237_s15  ;;  %s881_s9 = sshra.s32 %s248_s21, 4  ;;  %s882_s9 = int_to_ptr.hbm [resolvable:$true] %s881_s9 }
  0x15   : > { %s883_s10 = scalar_lea.hbm %s882_s9, 64  ;;  %p885_p2 = pneg %p1088_p13 }
  0x16   : > { %p884_p1 = scmp.ne.s32.totalorder %s882_s9, %s883_s10  ;;  %s888_s18 = scalar_lea.hbm %s1219_s0, 128 }
  0x17   : > { %p889_p5 = scmp.lt.s32.totalorder %s882_s9, %s1219_s0  ;;  %p890_p7 = scmp.lt.s32.totalorder %s888_s18, %s883_s10 }
  0x18   : > { %p886_p3 = pnand %p885_p2, %p884_p1 }
  0x19   : > { %p891_p8 = por %p890_p7, %p889_p5 }
  0x1a   : > { %p887_p4 = pneg %p886_p3 }
  0x1c   : > { %p892_p10 = pnand %p891_p8, %p887_p4 }
  0x1e   : > { %895 = shalt.err (!%p892_p10)
}
  0x1f   : > { %s979_s15 = smov 1024   ;;  %s980_s20 = smov 512  }
  0x20   : > { %s981_s22 = smov 32   ;;  %p257_p1 = scmp.lt.s32.totalorder %s977_s27, 3 }
  0x21   : > { %835 = dma.hbm_to_vmem [thread:$0]  (!%p1088_p13), %s248_s21, 1024, %s250_s23, %s238_s8, %s979_s15, %s980_s20, %s981_s22  }
  0x22   : > { %p258_p2 = pnand %p790_p0, %p257_p1 }
  0x23   : > { %s1107_s16 = sand.u32 (!%p258_p2), 1, %s969_s25  }
  0x24   : > { %261 = sbr.rel (%p258_p2) target bundleno = 501 (0x1f5), region = 48  ;;  %s791_s10 = sshll.u32 (!%p258_p2), %s1107_s16, 6 }
  0x25   : > { %s264_s9 = scalar_lea.sflag (!%p258_p2), [#allocation3], %s1107_s16  ;;  %s267_s17 = scalar_lea.vmem (!%p258_p2), [#allocation2], %s791_s10 }
  0x29   : > { %956 = dma.done.wait (%p1066_p6), %s264_s9, 1024  }
  0x2a   : > { %958 = vsyncadd (%p1066_p6), %s264_s9, 4294966272  ;;  %v982_v0 = vmov 0   ;;  %v305_v1 = vld [vmem:[%s267_s17 + $0x20] sm:$0xff]  ;;  %v306_v2 = vld [vmem:[%s267_s17 + $0x28] sm:$0xff]  ;;  %vm337_vm0 = vcmask 130048   ;;  %vm496_vm1 = vcmask 261120  }
  0x2b   : > { %879 = vset.pattern.permute.xlu1 %v982_v0  ;;  %878 = vset.pattern.permute.xlu0 %v982_v0  ;;  %v307_v3 = vld [vmem:[%s267_s17 + $0x30] sm:$0xff]  ;;  %v308_v4 = vld [vmem:[%s267_s17 + $0x38] sm:$0xff]  ;;  %v301_v5 = vld [vmem:[%s267_s17] sm:$0xff]  ;;  %s792_s21 = sshll.u32 %s1107_s16, 5  ;;  %s827_s12 = sshll.u32 %s1044_s28, 5 }
  0x2c   : > { %880 = vset.pattern.permute.xlu2 %v982_v0  ;;  %364 = vmatpush.msra.mxu0 %v305_v1  ;;  %v302_v6 = vld [vmem:[%s267_s17 + $0x8] sm:$0xff]  ;;  %v303_v7 = vld [vmem:[%s267_s17 + $0x10] sm:$0xff]  ;;  %v304_v8 = vld [vmem:[%s267_s17 + $0x18] sm:$0xff]  ;;  %s298_s23 = scalar_lea.vmem [#allocation5], %s792_s21  ;;  %s709_s18 = scalar_lea.hbm %s1226_s7, %s827_s12 }
  0x2d   : > { %393 = vmatpush.msra.mxu1 %v306_v2  ;;  %422 = vmatpush.msra.mxu2 %v307_v3  ;;  %v309_v9 = vld [vmem:[%s1220_s1] sm:$0xff]  ;;  %v314_v10 = vld [vmem:[%s1221_s2 + $0x8] sm:$0xff]  ;;  %v316_v11 = vld [vmem:[%s1221_s2 + $0x18] sm:$0xff]  ;;  %s711_s11 = sshll.u32 %s298_s23, 4  ;;  %s713_s19 = sshll.u32 %s709_s18, 4  ;;  %s712_s11 = int_to_ptr.vmem [resolvable:$true] %s711_s11  ;;  %s714_s19 = int_to_ptr.hbm [resolvable:$true] %s713_s19 }
  0x2e   : > { %451 = vmatpush.msra.mxu3 %v308_v4  ;;  %365 = vmatpush.msra.mxu0 %v301_v5  ;;  %v310_v12 = vld [vmem:[%s1220_s1 + $0x8] sm:$0xff]  ;;  %v313_v13 = vld [vmem:[%s1221_s2] sm:$0xff]  ;;  %v315_v14 = vld [vmem:[%s1221_s2 + $0x10] sm:$0xff]  ;;  %s698_s15 = scalar_lea.sflag [#allocation4], %s1107_s16  ;;  %s925_s20 = sshra.s32 %s714_s19, 4  ;;  %s926_s20 = int_to_ptr.hbm [resolvable:$true] %s925_s20 }
  0x2f   : > { %394 = vmatpush.msra.mxu1 %v302_v6  ;;  %423 = vmatpush.msra.mxu2 %v303_v7  ;;  %v311_v15 = vld [vmem:[%s1220_s1 + $0x10] sm:$0xff]  ;;  %v604_v16 = vld [vmem:[%s1225_s6] sm:$0xff]  ;;  %v312_v17 = vld [vmem:[%s1220_s1 + $0x18] sm:$0xff]  ;;  %s927_s22 = scalar_lea.hbm %s926_s20, 32  ;;  %s931_s9 = scalar_lea.hbm %s1226_s7, 64 }
  0x30   : > { %452 = vmatpush.msra.mxu3 %v304_v8  ;;  %793 = vmatmul.msk.f32.vlgmr.msra.gmra.mxu0 %vm337_vm0, %v309_v9  ;;  %v485_v30 = vld [vmem:[%s1223_s4 + $0x8] sm:$0xff]  ;;  %v484_v40 = vld [vmem:[%s1223_s4] sm:$0xff]  ;;  %p928_p6 = scmp.ne.s32.totalorder %s926_s20, %s927_s22  ;;  %p932_p3 = scmp.lt.s32.totalorder %s926_s20, %s1226_s7 }
  0x31   : > { %797 = vmatmul.msk.f32.vlgmr.msra.gmra.mxu1 %vm337_vm0, %v309_v9  ;;  %801 = vmatmul.msk.f32.vlgmr.msra.gmra.mxu2 %vm337_vm0, %v309_v9  ;;  %v482_v0 = vld [vmem:[%s1222_s3] sm:$0xff]  ;;  %p933_p4 = scmp.lt.s32.totalorder %s931_s9, %s927_s22 }
  0x32   : > { %805 = vmatmul.msk.f32.vlgmr.msra.gmra.mxu3 %vm337_vm0, %v309_v9  ;;  %324 = vperm.xlu1 %879, %v314_v10   ;;  %v483_v9 = vld [vmem:[%s1222_s3 + $0x8] sm:$0xff]  ;;  %p929_p13 = pnand %p928_p6, %p1073_p11 }
  0x33   : > { %334 = vperm.xlu0 %878, %v316_v11   ;;  %493 = vperm.xlu2 %880, %v485_v30   ;;  %p934_p5 = por %p933_p4, %p932_p3 }
  0x34   : > { %p930_p0 = pneg %p929_p13 }
  0x36   : > { %p935_p7 = pnand %p934_p5, %p930_p0 }
  0x38   : > { %794 = vmatmul.msk.f32.gmra.mxu0 %vm337_vm0, %v310_v12 }
  0x39   : > { %798 = vmatmul.msk.f32.gmra.mxu1 %vm337_vm0, %v310_v12  ;;  %802 = vmatmul.msk.f32.gmra.mxu2 %vm337_vm0, %v310_v12 }
  0x3a   : > { %806 = vmatmul.msk.f32.gmra.mxu3 %vm337_vm0, %v310_v12  ;;  %319 = vperm.xlu1 %879, %v313_v13  }
  0x3b   : > { %329 = vperm.xlu0 %878, %v315_v14   ;;  %488 = vperm.xlu2 %880, %v484_v40  }
  0x40   : > { %795 = vmatmul.msk.f32.gmra.mxu0 %vm337_vm0, %v311_v15 }
  0x41   : > { %799 = vmatmul.msk.f32.gmra.mxu1 %vm337_vm0, %v311_v15  ;;  %803 = vmatmul.msk.f32.gmra.mxu2 %vm337_vm0, %v311_v15 }
  0x42   : > { %807 = vmatmul.msk.f32.gmra.mxu3 %vm337_vm0, %v311_v15 }
  0x43   : > { %607 = vperm.xlu0 %878, %v604_v16  }
  0x48   : > { %796 = vmatmul.msk.f32.gmra.mxu0 %vm337_vm0, %v312_v17 }
  0x49   : > { %800 = vmatmul.msk.f32.gmra.mxu1 %vm337_vm0, %v312_v17  ;;  %804 = vmatmul.msk.f32.gmra.mxu2 %vm337_vm0, %v312_v17 }
  0x4a   : > { %808 = vmatmul.msk.f32.gmra.mxu3 %vm337_vm0, %v312_v17 }
  0x8d   : > { %v494_v10 = vpop.permute.xlu2 %493 }
  0x95   : > { %v489_v13 = vpop.permute.xlu2 %488 }
  0xa4   : > { %v325_v29 = vpop.permute.xlu1 %324 }
  0xa5   : > { %v335_v24 = vpop.permute.xlu0 %334 }
  0xac   : > { %v320_v45 = vpop.permute.xlu1 %319 }
  0xad   : > { %v367_v18 = vpop.f32.mrf.mxu0  ;;  %v330_v31 = vpop.permute.xlu0 %329 }
  0xae   : > { %v396_v19 = vpop.f32.mrf.mxu1  ;;  %v368_v48 = vadd.f32 %v367_v18, %v320_v45 }
  0xaf   : > { %v397_v49 = vadd.f32 %v396_v19, %v320_v45 }
  0xb0   : > { %v466_v58 = vmax.f32 %v368_v48, 0.0 }
  0xb1   : > { %v467_v59 = vmax.f32 %v397_v49, 0.0 }
  0xb4   : > { %v425_v20 = vpop.f32.mrf.mxu2 }
  0xb5   : > { %v454_v21 = vpop.f32.mrf.mxu3  ;;  %v370_v22 = vpop.f32.mrf.mxu0  ;;  %v426_v1 = vadd.f32 %v425_v20, %v320_v45 }
  0xb6   : > { %v399_v23 = vpop.f32.mrf.mxu1  ;;  %v371_v41 = vadd.f32 %v370_v22, %v325_v29  ;;  %v455_v2 = vadd.f32 %v454_v21, %v320_v45 }
  0xb7   : > { %v400_v42 = vadd.f32 %v399_v23, %v325_v29  ;;  %v468_v7 = vmax.f32 %v426_v1, 0.0 }
  0xb8   : > { %v470_v50 = vmax.f32 %v371_v41, 0.0  ;;  %v469_v8 = vmax.f32 %v455_v2, 0.0 }
  0xb9   : > { %v471_v51 = vmax.f32 %v400_v42, 0.0 }
  0xbc   : > { %v428_v25 = vpop.f32.mrf.mxu2 }
  0xbd   : > { %v457_v26 = vpop.f32.mrf.mxu3  ;;  %v373_v27 = vpop.f32.mrf.mxu0  ;;  %v429_v60 = vadd.f32 %v428_v25, %v325_v29 }
  0xbe   : > { %v402_v28 = vpop.f32.mrf.mxu1  ;;  %v374_v38 = vadd.f32 %v373_v27, %v330_v31  ;;  %v458_v61 = vadd.f32 %v457_v26, %v325_v29  ;;  %v603_v26 = vld [vmem:[%s1224_s5] sm:$0xff] }
  0xbf   : > { %v403_v39 = vadd.f32 %v402_v28, %v330_v31  ;;  %v472_v5 = vmax.f32 %v429_v60, 0.0 }
  0xc0   : > { %v474_v46 = vmax.f32 %v374_v38, 0.0  ;;  %v473_v6 = vmax.f32 %v458_v61, 0.0 }
  0xc1   : > { %v475_v47 = vmax.f32 %v403_v39, 0.0 }
  0xc4   : > { %v431_v32 = vpop.f32.mrf.mxu2 }
  0xc5   : > { %v460_v33 = vpop.f32.mrf.mxu3  ;;  %v376_v34 = vpop.f32.mrf.mxu0  ;;  %v432_v54 = vadd.f32 %v431_v32, %v330_v31 }
  0xc6   : > { %v405_v35 = vpop.f32.mrf.mxu1  ;;  %v377_v36 = vadd.f32 %v376_v34, %v335_v24  ;;  %v461_v55 = vadd.f32 %v460_v33, %v330_v31 }
  0xc7   : > { %v406_v37 = vadd.f32 %v405_v35, %v335_v24  ;;  %v476_v3 = vmax.f32 %v432_v54, 0.0 }
  0xc8   : > { %v478_v43 = vmax.f32 %v377_v36, 0.0  ;;  %v477_v4 = vmax.f32 %v461_v55, 0.0 }
  0xc9   : > { %v479_v44 = vmax.f32 %v406_v37, 0.0  ;;  %v608_v37 = vpop.permute.xlu0 %607 }
  0xca   : > { %515 = vmatpush.msrb.mxu0 %v478_v43 }
  0xcb   : > { %538 = vmatpush.msrb.mxu1 %v479_v44 }
  0xcc   : > { %v434_v52 = vpop.f32.mrf.mxu2  ;;  %516 = vmatpush.msrb.mxu0 %v474_v46 }
  0xcd   : > { %v463_v53 = vpop.f32.mrf.mxu3  ;;  %539 = vmatpush.msrb.mxu1 %v475_v47  ;;  %v435_v56 = vadd.f32 %v434_v52, %v335_v24 }
  0xce   : > { %v464_v57 = vadd.f32 %v463_v53, %v335_v24  ;;  %517 = vmatpush.msrb.mxu0 %v470_v50 }
  0xcf   : > { %540 = vmatpush.msrb.mxu1 %v471_v51  ;;  %v480_v62 = vmax.f32 %v435_v56, 0.0 }
  0xd0   : > { %v481_v63 = vmax.f32 %v464_v57, 0.0  ;;  %518 = vmatpush.msrb.mxu0 %v466_v58 }
  0xd1   : > { %541 = vmatpush.msrb.mxu1 %v467_v59  ;;  %561 = vmatpush.msrb.mxu2 %v480_v62 }
  0xd2   : > { %584 = vmatpush.msrb.mxu3 %v481_v63  ;;  %809 = vmatmul.msk.f32.vlgmr.msrb.gmra.mxu0 %vm496_vm1, %v482_v0 }
  0xd3   : > { %811 = vmatmul.msk.f32.vlgmr.msrb.gmra.mxu1 %vm496_vm1, %v482_v0  ;;  %562 = vmatpush.msrb.mxu2 %v476_v3 }
  0xd4   : > { %585 = vmatpush.msrb.mxu3 %v477_v4 }
  0xd5   : > { %563 = vmatpush.msrb.mxu2 %v472_v5 }
  0xd6   : > { %586 = vmatpush.msrb.mxu3 %v473_v6 }
  0xd7   : > { %564 = vmatpush.msrb.mxu2 %v468_v7 }
  0xd8   : > { %587 = vmatpush.msrb.mxu3 %v469_v8  ;;  %813 = vmatmul.msk.f32.vlgmr.msrb.gmra.mxu2 %vm496_vm1, %v482_v0 }
  0xd9   : > { %815 = vmatmul.msk.f32.vlgmr.msrb.gmra.mxu3 %vm496_vm1, %v482_v0 }
  0xda   : > { %810 = vmatmul.msk.f32.gmra.mxu0 %vm496_vm1, %v483_v9 }
  0xdb   : > { %812 = vmatmul.msk.f32.gmra.mxu1 %vm496_vm1, %v483_v9 }
  0xe0   : > { %814 = vmatmul.msk.f32.gmra.mxu2 %vm496_vm1, %v483_v9 }
  0xe1   : > { %816 = vmatmul.msk.f32.gmra.mxu3 %vm496_vm1, %v483_v9 }
 0x14f   : > { %v520_v11 = vpop.f32.mrf.mxu0 }
 0x150   : > { %v543_v12 = vpop.f32.mrf.mxu1  ;;  %v521_v14 = vadd.f32 %v520_v11, %v489_v13 }
 0x151   : > { %v544_v15 = vadd.f32 %v543_v12, %v489_v13 }
 0x152   : > { %v595_v22 = vmax.f32 %v521_v14, 0.0 }
 0x153   : > { %v596_v23 = vmax.f32 %v544_v15, 0.0 }
 0x157   : > { %v523_v16 = vpop.f32.mrf.mxu0 }
 0x158   : > { %v546_v17 = vpop.f32.mrf.mxu1  ;;  %v524_v18 = vadd.f32 %v523_v16, %v494_v10 }
 0x159   : > { %v547_v19 = vadd.f32 %v546_v17, %v494_v10 }
 0x15a   : > { %v599_v20 = vmax.f32 %v524_v18, 0.0 }
 0x15b   : > { %v600_v21 = vmax.f32 %v547_v19, 0.0  ;;  %v566_v24 = vpop.f32.mrf.mxu2 }
 0x15c   : > { %v589_v25 = vpop.f32.mrf.mxu3  ;;  %627 = vmatpush.msra.mxu0 %v599_v20  ;;  %v567_v29 = vadd.f32 %v566_v24, %v489_v13 }
 0x15d   : > { %647 = vmatpush.msra.mxu1 %v600_v21  ;;  %v590_v30 = vadd.f32 %v589_v25, %v489_v13 }
 0x15e   : > { %628 = vmatpush.msra.mxu0 %v595_v22  ;;  %v597_v35 = vmax.f32 %v567_v29, 0.0 }
 0x15f   : > { %648 = vmatpush.msra.mxu1 %v596_v23  ;;  %817 = vmatmul.msk.f32.vlgmr.msra.gmra.mxu0 %vm337_vm0, %v603_v26  ;;  %v598_v36 = vmax.f32 %v590_v30, 0.0 }
 0x160   : > { %818 = vmatmul.msk.f32.vlgmr.msra.gmra.mxu1 %vm337_vm0, %v603_v26 }
 0x163   : > { %v569_v27 = vpop.f32.mrf.mxu2 }
 0x164   : > { %v592_v28 = vpop.f32.mrf.mxu3  ;;  %v570_v31 = vadd.f32 %v569_v27, %v494_v10 }
 0x165   : > { %v593_v32 = vadd.f32 %v592_v28, %v494_v10 }
 0x166   : > { %v601_v33 = vmax.f32 %v570_v31, 0.0 }
 0x167   : > { %v602_v34 = vmax.f32 %v593_v32, 0.0 }
 0x168   : > { %667 = vmatpush.msra.mxu2 %v601_v33 }
 0x169   : > { %687 = vmatpush.msra.mxu3 %v602_v34 }
 0x16a   : > { %668 = vmatpush.msra.mxu2 %v597_v35 }
 0x16b   : > { %688 = vmatpush.msra.mxu3 %v598_v36  ;;  %819 = vmatmul.msk.f32.vlgmr.msra.gmra.mxu2 %vm337_vm0, %v603_v26 }
 0x16c   : > { %820 = vmatmul.msk.f32.vlgmr.msra.gmra.mxu3 %vm337_vm0, %v603_v26 }
 0x1dc   : > { %v630_v38 = vpop.f32.mrf.mxu0 }
 0x1dd   : > { %v650_v39 = vpop.f32.mrf.mxu1  ;;  %v631_v40 = vadd.f32 %v630_v38, %v608_v37 }
 0x1de   : > { %v651_v41 = vadd.f32 %v650_v39, %v608_v37 }
 0x1df   : > { %693 = vst [vmem:[%s298_s23] sm:$0xff] %v631_v40 }
 0x1e0   : > { %694 = vst [vmem:[%s298_s23 + $0x8] sm:$0xff] %v651_v41 }
 0x1ee   : > { %v670_v42 = vpop.f32.mrf.mxu2 }
 0x1ef   : > { %v690_v43 = vpop.f32.mrf.mxu3  ;;  %v671_v44 = vadd.f32 %v670_v42, %v608_v37 }
 0x1f0   : > { %v691_v45 = vadd.f32 %v690_v43, %v608_v37 }
 0x1f1   : > { %695 = vst [vmem:[%s298_s23 + $0x10] sm:$0xff] %v671_v44 }
 0x1f2   : > { %696 = vst [vmem:[%s298_s23 + $0x18] sm:$0xff] %v691_v45 }
 0x1f3   : > { %938 = shalt.err (!%p935_p7)
}
 0x1f4   : > { %830 = dma.vmem_to_hbm [thread:$0]  (%p1073_p11), %s712_s11, 512, %s714_s19, %s698_s15  }
 0x1f5 PF: > { %s725_s16 = sand.u32 1, %s965_s24   ;;  %p837_p8 = pnand %p786_p9, %p1077_p12 }
 0x1f6   : > { %s726_s23 = scalar_lea.sflag [#allocation4], %s725_s16 }
 0x1f7   : > { %p838_p10 = pneg %p837_p8 }
 0x1f9   : > { %960 = dma.done.wait (%p838_p10), %s726_s23, 512  }
 0x1fa   : > { %962 = vsyncadd (%p838_p10), %s726_s23, 4294966784  ;;  %s1233_s12 = sld [smem:[#allocation8_spill]]  ;;  %p20_p1 = scmp.ge.s32.totalorder %s1048_s30, 4  }
 0x1fb   : > { %s1234_s24 = smov %s969_s25  ;;  %s1235_s25 = smov %s973_s26 }
 0x1fc   : > { %s1237_s27 = smov %s1048_s30  ;;  %22 = sbr.rel (!%p20_p1) target bundleno = 5 (0x5), region = 93 }
 0x200   : > { %s1236_s26 = smov %s1233_s12 }
 0x201   :  { %732 = vsyncpa [#allocation3], 1 }
 0x202   :  { %734 = vsyncpa [#allocation3 + $0x1], 1 }
 0x203   :  { %735 = vsyncpa [#allocation4], 1 }
 0x204   :  { %737 = vsyncpa [#allocation4 + $0x1], 1 }

</bundles_post_ra>
